<compile_context>
chip_gen: v7x
topology: tpu7x:2x2x1
jax: 0.10.0
libtpu: 0.0.40
codegen_flags: <defaults>
</compile_context>

<pallas_src>
import math

import jax
import jax.numpy as jnp
from jax import lax
from jax.experimental import pallas as pl
from jax.experimental.pallas import tpu as pltpu


def eca_attention_kernel(x_ref, p_ref, mt_ref, o_ref):
    """Fused weighted-GAP -> channel-conv -> sigmoid -> scale for one batch block.

    x_ref : (Nb, C, HWp)  input block; channels on sublanes, padded H*W on lanes
    p_ref : (Nb, 1, HWp)  spatial weight * (1/HW); zero in padded lanes
    mt_ref: (C, C)        transposed banded conv matrix (s @ M^T == M @ s per batch)
    o_ref : (Nb, C, HWp)  output block
    """
    x = x_ref[...]

    # Weighted global-average pool folded onto the MXU (batched matmul):
    #   s[b, c] = sum_hw x[b, c, hw] * p[b, 0, hw]        (p already holds 1/HW)
    s = jnp.einsum('bch,bkh->bck', x, p_ref[...],
                   preferred_element_type=jnp.float32)              # (Nb, C, 1)
    s2 = s[:, :, 0]                                                 # (Nb, C)

    # Zero-padded k-tap channel conv as ONE small 2-D MXU matmul.
    # TODO(synk): for very large C (>= ~1024) replace the dense (C,C) band with
    # k pltpu.roll shifted-adds to avoid O(C^2) VMEM.
    a = jnp.dot(s2, mt_ref[...], preferred_element_type=jnp.float32)  # (Nb, C)

    att = jax.nn.sigmoid(a)                                         # EUP exp/recip
    o_ref[...] = (x * att[:, :, None]).astype(o_ref.dtype)


def eca_kernel_size(channels=None, gamma=2, beta=1):
    """Replicates the module's __init__ kernel-size formula."""
    if channels is None:
        return 3
    t = int(abs(math.log(channels, 2) + beta) / gamma)
    return max(t if t % 2 else t + 1, 3)


def _pick_batch_block(n, bytes_per_elem, target_bytes=2 << 20):
    """Largest divisor of n giving ~target_bytes per step while keeping >= 2
    grid steps when n >= 2 (so both v7x TensorCores get work)."""
    cap = max(1, int(target_bytes) // max(int(bytes_per_elem), 1))
    if n >= 2:
        cap = min(cap, n // 2)
    cap = max(1, min(cap, n))
    for nb in range(cap, 0, -1):
        if n % nb == 0:
            return nb
    return 1


def channel_attention_block(x_nchw, param, conv_weight):
    """Forward of Channel_attention_block_Param.

    x_nchw:      (N, C, H, W) float32
    param:       (1, 1, H, W) float32   (learnable spatial weighting)
    conv_weight: (1, 1, k)    float32   (Conv1d(1, 1, k, bias=False) weight)
    returns      (N, C, H, W)
    """
    N, C, H, W = x_nchw.shape
    HW = H * W
    k = conv_weight.shape[-1]
    pad = (k - 1) // 2
    w_tap = conv_weight.reshape(k).astype(jnp.float32)

    # Banded (C, C) matrix reproducing Conv1d(1,1,k,padding=pad,bias=False) over
    # channels: M[c, c2] = w[c2 - c + pad] inside the band, 0 outside.  Passed
    # transposed so the kernel does a plain row-vector matmul s @ M^T.
    cidx = jnp.arange(C)
    tap = cidx[None, :] - cidx[:, None] + pad
    band = jnp.where((tap >= 0) & (tap < k),
                     w_tap[jnp.clip(tap, 0, k - 1)], 0.0).astype(jnp.float32)
    band_t = band.T

    # Lane-dense spatial axis: pad H*W up to a multiple of 128 so in/out blocks
    # use full-width unmasked vector stores and full-rate DMAs.
    HWp = ((HW + 127) // 128) * 128
    x3 = x_nchw.reshape(N, C, HW)
    if HWp != HW:
        x3 = jnp.pad(x3, ((0, 0), (0, 0), (0, HWp - HW)))

    # Spatial weight with the 1/HW mean folded in; zero in padded lanes so they
    # contribute nothing to the pool.
    p1 = param.reshape(HW).astype(jnp.float32) * (1.0 / HW)
    if HWp != HW:
        p1 = jnp.pad(p1, (0, HWp - HW))

    itemsize = jnp.dtype(x_nchw.dtype).itemsize
    bytes_per_elem = C * HWp * itemsize
    Nb = _pick_batch_block(N, bytes_per_elem)
    grid_n = N // Nb
    p3 = jnp.broadcast_to(p1[None, None, :], (Nb, 1, HWp))

    # Explicit VMEM budget: double-buffered in/out blocks + small operands +
    # headroom for in-kernel temporaries, clamped to fit every TPU generation.
    # TODO(synk): for C*HWp slabs too large for VMEM, switch to a streamed
    # two-pass body (pool pass, then scale pass) over HW tiles.
    block_bytes = Nb * bytes_per_elem
    aux_bytes = 2 * (Nb * HWp * 4 + C * C * 4)
    vmem_limit = int(min(max(5 * block_bytes + aux_bytes + (2 << 20), 8 << 20),
                         48 << 20))

    cost = pl.CostEstimate(
        flops=int(3 * N * C * HWp + 2 * N * C * C),
        transcendentals=int(N * C),
        bytes_accessed=int(2 * N * C * HWp * itemsize + (N * HWp + C * C) * 4),
    )

    out = pl.pallas_call(
        eca_attention_kernel,
        out_shape=jax.ShapeDtypeStruct((N, C, HWp), x_nchw.dtype),
        grid_spec=pltpu.PrefetchScalarGridSpec(
            num_scalar_prefetch=0,
            grid=(grid_n,),
            in_specs=[
                pl.BlockSpec((Nb, C, HWp), lambda n: (n, 0, 0)),   # x batch-block
                pl.BlockSpec((Nb, 1, HWp), lambda n: (0, 0, 0)),   # spatial weight
                pl.BlockSpec((C, C), lambda n: (0, 0)),            # band^T
            ],
            out_specs=pl.BlockSpec((Nb, C, HWp), lambda n: (n, 0, 0)),
        ),
        compiler_params=pltpu.CompilerParams(
            dimension_semantics=("parallel",),
            vmem_limit_bytes=vmem_limit),
        cost_estimate=cost,
    )(x3, p3, band_t)

    if HWp != HW:
        out = out[:, :, :HW]
    return out.reshape(N, C, H, W)


def _reference(x, param, conv_weight):
    """Pure-JAX reference matching the PyTorch forward."""
    k = conv_weight.shape[-1]
    pad = (k - 1) // 2
    s = jnp.mean(param * x, axis=(2, 3))                      # (N, C)
    a = lax.conv_general_dilated(
        s[:, None, :], conv_weight, window_strides=(1,),
        padding=[(pad, pad)],
        dimension_numbers=("NCH", "OIH", "NCH"))              # (N, 1, C)
    att = jax.nn.sigmoid(a)[:, 0, :]                          # (N, C)
    return x * att[:, :, None, None]


if __name__ == "__main__":
    # Small shapes consistent with the module: x is BCHW.
    N, C, H, W = 2, 4, 16, 16
    gamma, beta = 2, 1
    k = eca_kernel_size(C, gamma, beta)                       # -> 3 for C=4

    key = jax.random.PRNGKey(0)
    kx, kp, kw = jax.random.split(key, 3)
    x = jax.random.normal(kx, (N, C, H, W), dtype=jnp.float32)
    # nn.Parameter is initialised to ones in the module; perturb it so the
    # learnable spatial weighting is actually exercised by the test.
    param = 1.0 + 0.1 * jax.random.normal(kp, (1, 1, H, W), dtype=jnp.float32)
    # Conv1d(1, 1, k, bias=False) weight.
    conv_w = 0.5 * jax.random.normal(kw, (1, 1, k), dtype=jnp.float32)

    out = channel_attention_block(x, param, conv_w)
    out = jax.block_until_ready(out)

    ref = jax.block_until_ready(_reference(x, param, conv_w))
    assert out.shape == (N, C, H, W)
    assert jnp.allclose(out, ref, atol=1e-5, rtol=1e-4), (
        f"mismatch vs reference, max abs diff = {jnp.max(jnp.abs(out - ref))}")

    print("KERNEL_OK")
</pallas_src>

<mosaic_0001>
module attributes {stable_mosaic.version = 11 : i64} {
  func.func @eca_attention_kernel(%arg0: i32, %arg1: memref<1x4x256xf32, #tpu.memory_space<vmem>>, %arg2: memref<1x1x256xf32, #tpu.memory_space<vmem>>, %arg3: memref<4x4xf32, #tpu.memory_space<vmem>>, %arg4: memref<1x4x256xf32, #tpu.memory_space<vmem>>) attributes {dimension_semantics = [#tpu.dimension_semantics<parallel>], iteration_bounds = array<i64: 2>, scalar_prefetch = 0 : i64, scratch_operands = 0 : i64, tpu.core_type = #tpu.core_type<tc>, window_params = [{transform_indices = @transform_0, window_bounds = array<i64: 1, 4, 256>}, {pipeline_mode = #tpu.pipeline_mode<synchronous>, transform_indices = @transform_1, window_bounds = array<i64: 1, 1, 256>}, {pipeline_mode = #tpu.pipeline_mode<synchronous>, transform_indices = @transform_2, window_bounds = array<i64: 4, 4>}, {transform_indices = @transform_3, window_bounds = array<i64: 1, 4, 256>}]} {
    %c0 = arith.constant 0 : index
    %c0_0 = arith.constant 0 : index
    %c0_1 = arith.constant 0 : index
    %0 = vector.load %arg1[%c0, %c0_0, %c0_1] : memref<1x4x256xf32, #tpu.memory_space<vmem>>, vector<1x4x256xf32>
    %c0_2 = arith.constant 0 : index
    %c0_3 = arith.constant 0 : index
    %c0_4 = arith.constant 0 : index
    %1 = vector.load %arg2[%c0_2, %c0_3, %c0_4] : memref<1x1x256xf32, #tpu.memory_space<vmem>>, vector<1x1x256xf32>
    "tpu.trace_start"() <{level = 10 : i32, message = "bch,bkh->bck"}> : () -> ()
    %cst = arith.constant dense<0.000000e+00> : vector<1x4x1xf32>
    %2 = tpu.matmul %0, %1, %cst {dimension_numbers = #tpu.dot_dimension_numbers<[2], [2], [1], [1], [0, 0, 0, 1, 1, 1], [0], [0]>} : vector<1x4x256xf32>, vector<1x1x256xf32>, vector<1x4x1xf32> -> vector<1x4x1xf32>
    "tpu.trace_stop"() : () -> ()
    %3 = vector.shape_cast %2 : vector<1x4x1xf32> to vector<1x4xf32>
    %c0_5 = arith.constant 0 : index
    %c0_6 = arith.constant 0 : index
    %4 = vector.load %arg3[%c0_5, %c0_6] : memref<4x4xf32, #tpu.memory_space<vmem>>, vector<4x4xf32>
    %cst_7 = arith.constant dense<0.000000e+00> : vector<1x4xf32>
    %5 = tpu.matmul %3, %4, %cst_7 {dimension_numbers = #tpu.dot_dimension_numbers<[1], [0], [0], [1], [0, 0, 1, 1], [], []>} : vector<1x4xf32>, vector<4x4xf32>, vector<1x4xf32> -> vector<1x4xf32>
    %6 = arith.negf %5 : vector<1x4xf32>
    %7 = math.exp %6 : vector<1x4xf32>
    %cst_8 = arith.constant 1.000000e+00 : f32
    %8 = vector.broadcast %cst_8 : f32 to vector<1x4xf32>
    %9 = arith.addf %8, %7 : vector<1x4xf32>
    %10 = arith.divf %8, %9 : vector<1x4xf32>
    %11 = vector.shape_cast %10 : vector<1x4xf32> to vector<1x4x1xf32>
    %12 = vector.broadcast %11 : vector<1x4x1xf32> to vector<1x4x256xf32>
    %13 = arith.mulf %0, %12 : vector<1x4x256xf32>
    %c0_9 = arith.constant 0 : index
    %c0_10 = arith.constant 0 : index
    %c0_11 = arith.constant 0 : index
    %14 = vector.load %arg4[%c0_9, %c0_10, %c0_11] : memref<1x4x256xf32, #tpu.memory_space<vmem>>, vector<1x4x256xf32>
    tpu.vector_store %arg4[%c0_9, %c0_10, %c0_11], %13 {strides = array<i32>} : memref<1x4x256xf32, #tpu.memory_space<vmem>>, vector<1x4x256xf32>,
    return
  }
  func.func @transform_0(%arg0: i32) -> (i32, i32, i32) {
    %c0_i32 = arith.constant 0 : i32
    %c0_i32_0 = arith.constant 0 : i32
    %c0_i32_1 = arith.constant 0 : i32
    return %arg0, %c0_i32, %c0_i32_0 : i32, i32, i32
  }
  func.func @transform_1(%arg0: i32) -> (i32, i32, i32) {
    %c0_i32 = arith.constant 0 : i32
    %c0_i32_0 = arith.constant 0 : i32
    %c0_i32_1 = arith.constant 0 : i32
    %c0_i32_2 = arith.constant 0 : i32
    return %c0_i32, %c0_i32_0, %c0_i32_1 : i32, i32, i32
  }
  func.func @transform_2(%arg0: i32) -> (i32, i32) {
    %c0_i32 = arith.constant 0 : i32
    %c0_i32_0 = arith.constant 0 : i32
    %c0_i32_1 = arith.constant 0 : i32
    return %c0_i32, %c0_i32_0 : i32, i32
  }
  func.func @transform_3(%arg0: i32) -> (i32, i32, i32) {
    %c0_i32 = arith.constant 0 : i32
    %c0_i32_0 = arith.constant 0 : i32
    %c0_i32_1 = arith.constant 0 : i32
    return %arg0, %c0_i32, %c0_i32_0 : i32, i32, i32
  }
}

</mosaic_0001>

<bundles_post_ra>
// kernel: tpu_custom_call.1
= control target key start
LH: loop header
LB: loop body
LE: loop exit
PB: predicated region body
PF: predicated region fallthrough
CT: control target
= control target key end

     0   :  { %8 = vsyncpa [#allocation3], 0  ;;  %s776_s0 = inlined_call_operand.hbm [shape: f32[2,4,256], index: 0, kind: input, shape index: {}]   ;;  %s777_s1 = inlined_call_operand.vmem [shape: f32[1,1,256], index: 1, kind: input, shape index: {}]   ;;  %s778_s2 = inlined_call_operand.vmem [shape: f32[4,4], index: 2, kind: input, shape index: {}]   ;;  %s779_s3 = inlined_call_operand.hbm [shape: f32[2,4,256], index: 3, kind: output, shape index: {}]  }
   0x1   :  { %10 = vsyncpa [#allocation3 + $0x1], 0 }
   0x2   :  { %11 = vsyncpa [#allocation4], 0 }
   0x3   :  { %13 = vsyncpa [#allocation4 + $0x1], 0  ;;  %s605_s12 = smov 0   ;;  %s607_s13 = smov 0  }
   0x4   :  { %s609_s14 = smov 0   ;;  %s611_s15 = smov 0  }
   0x5 LB: > { %s626_s16 = sadd.s32 4294967295, %s578_s15   ;;  %s403_s17 = sadd.s32 4294967294, %s578_s15   ;;  %s578_s15 = sphi %s611_s15, %s794_s15   ;;  %s574_s14 = sphi %s609_s14, %s793_s14   ;;  %s570_s13 = sphi %s607_s13, %s792_s13   ;;  %s566_s12 = sphi %s605_s12, %s791_s12  }
   0x6   : > { %s630_s18 = sadd.s32 1, %s578_s15   ;;  %s26_s19 = sadd.s32 1, %s574_s14 }
   0x7   : > { %s23_s20 = ssub.s32 %s578_s15, %s630_s18  ;;  %p33_p0 = scmp.ne.s32.totalorder %s574_s14, %s570_s13 }
   0x8   : > { %p24_p1 = scmp.eq.s32.totalorder %s23_s20, 0  ;;  %p34_p2 = scmp.eq.s32.totalorder %s578_s15, 0 }
   0x9   : > { %p39_p3 = scmp.ne.s32.totalorder %s570_s13, %s566_s12  ;;  %p40_p4 = scmp.eq.s32.totalorder %s626_s16, 0 }
   0xa   : > { %s642_s21 = scalar_select %p24_p1, %s574_s14, %s26_s19  }
   0xb   : > { %p644_p5 = por %p34_p2, %p33_p0  ;;  %p648_p6 = por %p40_p4, %p39_p3 }
   0xc   : > { %p105_p7 = scmp.eq.s32.totalorder %s626_s16, 1  ;;  %p111_p8 = scmp.eq.s32.totalorder %s403_s17, 1 }
   0xd   : > { %p441_p10 = scmp.lt.s32.totalorder %s578_s15, 2  ;;  %s137_s26 = sand.u32 1, %s574_s14  }
   0xe   : > { %p655_p11 = por %p105_p7, %p33_p0  ;;  %p659_p12 = por %p111_p8, %p39_p3 }
   0xf   : > { %s420_s27 = sshll.u32 %s578_s15, 7  ;;  %s406_s28 = sshll.u32 %s137_s26, 3 }
  0x10   : > { %s783_s24 = scalar_select %p655_p11, 1, 0 }
  0x11   : > { %s784_s25 = scalar_select %p659_p12, 1, 0 }
  0x12   : > { %s668_s4 = scalar_lea.hbm %s776_s0, %s420_s27  ;;  %s141_s5 = scalar_lea.vmem [#allocation2], %s406_s28 }
  0x13   : > { %s149_s6 = sshll.u32 %s141_s5, 4  ;;  %p672_p13 = pnand %p441_p10, %p644_p5  ;;  %s676_s6 = int_to_ptr.vmem [resolvable:$true] %s149_s6 }
  0x14   : > { %s138_s8 = scalar_lea.sflag [#allocation3], %s137_s26  ;;  %s482_s9 = scalar_lea.hbm %s668_s4, 128 }
  0x15   : > { %p483_p2 = scmp.ne.s32.totalorder %s668_s4, %s482_s9  ;;  %p484_p3 = pneg %p672_p13 }
  0x16   : > { %s487_s17 = scalar_lea.hbm %s776_s0, 256  ;;  %p488_p5 = scmp.lt.u32.totalorder %s668_s4, %s776_s0 }
  0x17   : > { %p485_p4 = pnand %p484_p3, %p483_p2  ;;  %p489_p8 = scmp.lt.u32.totalorder %s487_s17, %s482_s9 }
  0x18   : > { %p491_p9 = scmp.lt.u32.totalorder %s482_s9, %s668_s4 }
  0x19   : > { %p486_p7 = pneg %p485_p4  ;;  %p490_p10 = por %p489_p8, %p488_p5 }
  0x1b   : > { %p492_p0 = por %p491_p9, %p490_p10 }
  0x1d   : > { %p493_p1 = pnand %p492_p0, %p486_p7 }
  0x1f   : > { %496 = shalt.err (!%p493_p1)
}
  0x20   : > { %s497_s22 = scalar_lea.vmem %s676_s6, 128  ;;  %s580_s26 = smov [#allocation2]  }
  0x21   : > { %p498_p2 = scmp.ne.s32.totalorder %s676_s6, %s497_s22  ;;  %s502_s27 = sshll.u32 %s580_s26, 4  ;;  %s503_s27 = int_to_ptr.vmem [resolvable:$false] %s502_s27 }
  0x22   : > { %s504_s28 = scalar_lea.vmem %s503_s27, 256  ;;  %p505_p11 = scmp.lt.s32.totalorder %s676_s6, %s503_s27 }
  0x23   : > { %p500_p4 = pnand %p498_p2, %p484_p3  ;;  %p506_p5 = scmp.lt.s32.totalorder %s504_s28, %s497_s22 }
  0x25   : > { %p501_p12 = pneg %p500_p4  ;;  %p507_p8 = por %p506_p5, %p505_p11 }
  0x27   : > { %p508_p9 = pnand %p507_p8, %p501_p12 }
  0x29   : > { %511 = shalt.err (!%p508_p9)
}
  0x2a   : > { %436 = dma.hbm_to_vmem [thread:$0]  (!%p672_p13), %s668_s4, 128, %s676_s6, %s138_s8  }
  0x2b   : > { %p786_p0 = scmp.lt.s32.totalorder %s578_s15, 3  ;;  %p787_p1 = scmp.ge.s32.totalorder %s578_s15, 1 }
  0x2d   : > { %p155_p3 = pnand %p787_p1, %p786_p0 }
  0x2e   : > { %s710_s29 = sand.u32 (!%p155_p3), 1, %s570_s13  }
  0x2f   : > { %158 = sbr.rel (%p155_p3) target bundleno = 589 (0x24d), region = 32  ;;  %s410_s30 = sshll.u32 (!%p155_p3), %s710_s29, 3 }
  0x30   : > { %s161_s5 = scalar_lea.sflag (!%p155_p3), [#allocation3], %s710_s29  ;;  %s164_s7 = scalar_lea.vmem (!%p155_p3), [#allocation2], %s410_s30 }
  0x36   : > { %557 = dma.done.wait (%p648_p6), %s161_s5, 128  }
  0x37   : > { %559 = vsyncadd (%p648_p6), %s161_s5, 4294967168  ;;  %v190_v0 = vlaneseq  ;;  %v188_v4 = vld [vmem:[%s777_s1] sm:$0x3]  ;;  %vm204_vm0 = vcmask 1043456   ;;  %v581_v14 = vmov 0.0   ;;  %vm582_vm1 = vmmov 0  }
  0x38   : > { %v187_v7 = vld [vmem:[%s164_s7] sm:$0xff]  ;;  %424 = vmatprep.subr.mxu0 %v581_v14  ;;  %426 = vmatprep.mubr.msk.f32.mxu0 %vm582_vm1, %v581_v14  ;;  %vm218_vm2 = vcmask 31744   ;;  %v583_v27 = vmov 839922192   ;;  %s421_s9 = sshll.u32 %s626_s16, 7  ;;  %s186_s10 = scalar_lea.vmem [#allocation5], %s410_s30 }
  0x39   : > { %v191_v1 = vshrl.u32 %v190_v0, 7  ;;  %v210_v15 = vld [vmem:[%s778_s2] sm:$0xf]  ;;  %v213_v16 = vand.u32 127, %v190_v0  ;;  %v309_v28 = vunpack.c.l.s4 %v583_v27  ;;  %s333_s11 = sshll.u32 %s186_s10, 4  ;;  %s732_s20 = scalar_lea.hbm %s779_s3, %s421_s9  ;;  %s734_s11 = int_to_ptr.vmem [resolvable:$true] %s333_s11 }
  0x3a   : > { %425 = vmatpush3.msk.msra.mxu0 %vm204_vm0, %v210_v15  ;;  %s319_s22 = scalar_lea.sflag [#allocation4], %s710_s29  ;;  %s512_s26 = scalar_lea.vmem %s734_s11, 128 }
  0x3b   : > { %v192_v2 = vsub.s32 0, %v191_v1  ;;  %v196_v3 = vsub.s32 1, %v191_v1  ;;  %v216_v17 = vsub.s32 %v213_v16, %v191_v1  ;;  %v310_v29 = vunpack.c.0.s8 %v309_v28  ;;  %p513_p6 = scmp.ne.s32.totalorder %s734_s11, %s512_s26  ;;  %p788_p11 = scmp.ne.s32.totalorder %s783_s24, 0 }
  0x3c   : > { %s584_s16 = smov [#allocation5]  }
  0x3d   : > { %v193_v5 = vrot.slane %v188_v4, %v192_v2  ;;  %v197_v6 = vrot.slane %v188_v4, %v196_v3  ;;  %v313_v30 = vsub.s32 %v310_v29, %v191_v1  ;;  %p514_p12 = pnand %p513_p6, %p788_p11  ;;  %s516_s27 = sshll.u32 %s584_s16, 4  ;;  %s517_s27 = int_to_ptr.vmem [resolvable:$false] %s516_s27 }
  0x3e   : > { %s518_s28 = scalar_lea.vmem %s517_s27, 256  ;;  %p519_p7 = scmp.lt.s32.totalorder %s734_s11, %s517_s27 }
  0x3f   : > { %v198_v8 = vcombine.low %v193_v5, %v197_v6  ;;  %p515_p13 = pneg %p514_p12  ;;  %p520_p10 = scmp.lt.s32.totalorder %s518_s28, %s512_s26 }
  0x41   : > { %v200_v9 = vmul.f32 %v198_v8, %v187_v7  ;;  %p521_p2 = por %p520_p10, %p519_p7 }
  0x43   : > { %v202_v10 = vcombine.high %v200_v9, %v200_v9  ;;  %v205_v11 = vsel %vm204_vm0, %v200_v9, 0.0  ;;  %p522_p4 = pnand %p521_p2, %p515_p13 }
  0x45   : > { %v206_v12 = vsel %vm204_vm0, %v202_v10, 0.0 }
  0x46   : > { %v207_v13 = vadd.f32 %v206_v12, %v205_v11 }
  0x48   : > { %208 = vadd.xlane.f32.xlu0 %v207_v13 }
  0xd5   : > { %v209_v18 = vpop.xlane.xlu0 %208 }
  0xd6   : > { %v217_v19 = vrot.slane %v209_v18, %v216_v17 }
  0xd8   : > { %427 = vmatmul.mubr.msk.f32.vlgmr.msra.gmra.mrb[0].mxu0 %vm218_vm2, %v217_v19 }
 0x1ab   : > { %v290_v20 = vpop.f32.mrb[0].mxu0 }
 0x1ac   : > { %v414_v21 = vmul.f32 -1.442695, %v290_v20  ;;  %v428_v22 = vpop.f32.mrb[1].mxu0 }
 0x1ae   : > { %478 = vpow2.f32 %v414_v21 }
 0x1b8   : > { %v479_v23 = vpop.eup %478 }
 0x1b9   : > { %v297_v24 = vadd.f32 1.0, %v479_v23 }
 0x1bb   : > { %480 = vrcp.f32 %v297_v24 }
 0x1c5   : > { %v481_v25 = vpop.eup %480 }
 0x1c6   : > { %v303_v26 = vrot.slane %v481_v25, %v192_v2 }
 0x1c8   : > { %305 = vbcast.lane.b32.xlu0 %v303_v26, 256 }
 0x23a   : > { %v306_v31 = vpop.permute.xlu0 %305 }
 0x23b   : > { %v314_v32 = vrot.slane %v306_v31, %v313_v30 }
 0x23d   : > { %v316_v33 = vmul.f32 %v314_v32, %v187_v7 }
 0x23f   : > { %317 = vst [vmem:[%s186_s10] sm:$0xff] %v316_v33 }
 0x240   : > { %525 = shalt.err (!%p522_p4)
}
 0x241   : > { %s526_s29 = scalar_lea.hbm %s732_s20, 128  ;;  %s530_s7 = scalar_lea.hbm %s779_s3, 256 }
 0x242   : > { %p527_p5 = scmp.ne.s32.totalorder %s732_s20, %s526_s29  ;;  %p531_p0 = scmp.lt.u32.totalorder %s732_s20, %s779_s3 }
 0x243   : > { %p532_p1 = scmp.lt.u32.totalorder %s530_s7, %s526_s29  ;;  %p534_p6 = scmp.lt.u32.totalorder %s526_s29, %s732_s20 }
 0x244   : > { %p528_p8 = pnand %p527_p5, %p788_p11 }
 0x245   : > { %p533_p3 = por %p532_p1, %p531_p0 }
 0x246   : > { %p529_p9 = pneg %p528_p8 }
 0x247   : > { %p535_p12 = por %p534_p6, %p533_p3 }
 0x249   : > { %p536_p13 = pnand %p535_p12, %p529_p9 }
 0x24b   : > { %539 = shalt.err (!%p536_p13)
}
 0x24c   : > { %431 = dma.vmem_to_hbm [thread:$0]  (%p788_p11), %s734_s11, 128, %s732_s20, %s319_s22  }
 0x24d PF: > { %s345_s23 = sand.u32 1, %s566_s12   ;;  %p789_p7 = scmp.ne.s32.totalorder %s784_s25, 0 }
 0x24e   : > { %p790_p10 = scmp.ge.s32.totalorder %s578_s15, 2  ;;  %s346_s8 = scalar_lea.sflag [#allocation4], %s345_s23 }
 0x250   : > { %p438_p2 = pnand %p790_p10, %p789_p7 }
 0x252   : > { %561 = dma.done.wait (!%p438_p2), %s346_s8, 128  }
 0x253   : > { %563 = vsyncadd (!%p438_p2), %s346_s8, 4294967168  ;;  %p16_p4 = scmp.ge.s32.totalorder %s630_s18, 4   ;;  %s791_s12 = smov %s570_s13 }
 0x254   : > { %s792_s13 = smov %s574_s14  ;;  %s793_s14 = smov %s642_s21 }
 0x255   : > { %s794_s15 = smov %s630_s18  ;;  %18 = sbr.rel (!%p16_p4) target bundleno = 5 (0x5), region = 77 }
 0x25c   :  { %351 = vsyncpa [#allocation3], 1 }
 0x25d   :  { %353 = vsyncpa [#allocation3 + $0x1], 1 }
 0x25e   :  { %354 = vsyncpa [#allocation4], 1 }
 0x25f   :  { %356 = vsyncpa [#allocation4 + $0x1], 1 }

</bundles_post_ra>
